<compile_context>
chip_gen: v7x
topology: tpu7x:2x2x1
jax: 0.10.0
libtpu: 0.0.40
codegen_flags: <defaults>
</compile_context>

<pallas_src>
import math
import functools

import jax
import jax.numpy as jnp
import numpy as np
from jax.experimental import pallas as pl
from jax.experimental.pallas import tpu as pltpu


# ----------------------------------------------------------------------------
# Kernel 1: GroupNorm apply (precomputed scale/shift) + fused QKV projection
# ----------------------------------------------------------------------------
def _qkv_proj_kernel(x_ref, scale_ref, shift_ref, wqkv_ref, bqkv_ref,
                     q_ref, k_ref, v_ref, *, c):
    # normalize with per-(batch, channel) scale/shift precomputed in f32
    xn = x_ref[0] * scale_ref[0] + shift_ref[0]            # (TT, C) f32
    # one fused MXU pass: (TT, C) x (C, 3C); bf16 operands, f32 accumulation
    qkv = jnp.dot(xn.astype(wqkv_ref.dtype), wqkv_ref[...],
                  preferred_element_type=jnp.float32) + bqkv_ref[...]
    qkv = qkv.astype(q_ref.dtype)
    q_ref[0] = qkv[:, :c]           # 1/sqrt(C) already folded into wq/bq
    k_ref[0] = qkv[:, c:2 * c]
    v_ref[0] = qkv[:, 2 * c:]


# ----------------------------------------------------------------------------
# Kernel 2: flash attention (online softmax) + output projection + residual
# ----------------------------------------------------------------------------
def _flash_attn_kernel(q_ref, k_ref, v_ref, x_ref, wo_ref, bo_ref, o_ref,
                       m_sc, l_sc, acc_sc, *, approx_recip):
    ki = pl.program_id(2)

    @pl.when(ki == 0)
    def _():
        m_sc[...] = jnp.full_like(m_sc, -jnp.inf)
        l_sc[...] = jnp.zeros_like(l_sc)
        acc_sc[...] = jnp.zeros_like(acc_sc)

    q = q_ref[0]                                           # (TQ, C)  (pre-scaled)
    k = k_ref[0]                                           # (TKV, C)
    # contract over the channel dim of both operands -- no explicit k.T
    s = jax.lax.dot_general(q, k, (((1,), (1,)), ((), ())),
                            preferred_element_type=jnp.float32)    # (TQ, TKV) f32

    m_prev = m_sc[...]
    m_new = jnp.maximum(m_prev, jnp.max(s, axis=-1, keepdims=True))
    alpha = jnp.exp(m_prev - m_new)
    p = jnp.exp(s - m_new)
    l_sc[...] = alpha * l_sc[...] + jnp.sum(p, axis=-1, keepdims=True)
    acc_sc[...] = alpha * acc_sc[...] + jnp.dot(
        p.astype(v_ref.dtype), v_ref[0], preferred_element_type=jnp.float32)
    m_sc[...] = m_new

    @pl.when(ki == pl.num_programs(2) - 1)
    def _():
        attn = acc_sc[...] * pl.reciprocal(l_sc[...], approx=approx_recip)
        y = jnp.dot(attn.astype(wo_ref.dtype), wo_ref[...],
                    preferred_element_type=jnp.float32) + bo_ref[...]
        o_ref[0] = (y + x_ref[0]).astype(o_ref.dtype)      # fused residual add


def _pick_tile(total, target):
    """Largest divisor of `total` that is <= target and sublane-friendly."""
    t = min(total, target)
    while total % t != 0:
        t -= 1
    if t != total and t % 8 != 0:   # keep second-to-last block dim % 8 == 0
        return total
    return t


# ----------------------------------------------------------------------------
# Wrapper
# ----------------------------------------------------------------------------
def attention_pallas(x_nchw, params, num_groups, *,
                     compute_dtype=jnp.bfloat16,
                     tq_target=256, tkv_target=512, tt_target=256):
    """x_nchw: (B, C, H, W) float32.  Returns (B, C, H, W) float32."""
    B, C, H, W = x_nchw.shape
    T = H * W
    eps = 1e-5
    gs = C // num_groups
    inv_sqrt_c = 1.0 / math.sqrt(C)
    approx_recip = bool(jnp.dtype(compute_dtype) == jnp.dtype(jnp.bfloat16))

    # NCHW -> (B, T, C)
    x_btc = jnp.transpose(x_nchw, (0, 2, 3, 1)).reshape(B, T, C).astype(jnp.float32)

    # ---- GroupNorm statistics: tiny per-(batch, group) two-pass f32 reduction,
    #      folded into a per-(batch, channel) scale/shift so kernel 1 does one FMA.
    xg = x_btc.reshape(B, T, num_groups, gs)
    mean_g = jnp.mean(xg, axis=(1, 3))                                   # (B, G)
    var_g = jnp.mean((xg - mean_g[:, None, :, None]) ** 2, axis=(1, 3))  # (B, G)
    mean_c = jnp.repeat(mean_g, gs, axis=-1)[:, None, :]                 # (B, 1, C)
    istd_c = jnp.repeat(jax.lax.rsqrt(var_g + eps), gs, axis=-1)[:, None, :]
    gamma = params["gn_gamma"].reshape(1, 1, C).astype(jnp.float32)
    beta = params["gn_beta"].reshape(1, 1, C).astype(jnp.float32)
    scale_c = istd_c * gamma                                             # (B, 1, C)
    shift_c = beta - mean_c * scale_c                                    # (B, 1, C)

    # Conv2d 1x1 weight (Cout, Cin, 1, 1) -> matmul weight (Cin, Cout); fuse q/k/v.
    # Fold the 1/sqrt(C) attention scale into the q projection (weights + bias).
    wq = params["wq"].reshape(C, C).T * inv_sqrt_c
    wk = params["wk"].reshape(C, C).T
    wv = params["wv"].reshape(C, C).T
    wqkv = jnp.concatenate([wq, wk, wv], axis=1).astype(compute_dtype)   # (C, 3C)
    bqkv = jnp.concatenate([params["bq"].reshape(1, C) * inv_sqrt_c,
                            params["bk"].reshape(1, C),
                            params["bv"].reshape(1, C)], axis=1).astype(jnp.float32)
    wo = params["wo"].reshape(C, C).T.astype(compute_dtype)
    bo = params["bo"].reshape(1, C).astype(jnp.float32)

    tt = _pick_tile(T, tt_target)
    tq = _pick_tile(T, tq_target)
    tkv = _pick_tile(T, tkv_target)
    vmem_limit = 32 * 1024 * 1024   # ample for the ~6 MiB resident set, safe on v7x

    # ---------------- Kernel 1: GN apply + fused QKV projection ----------------
    q, k, v = pl.pallas_call(
        functools.partial(_qkv_proj_kernel, c=C),
        out_shape=tuple(jax.ShapeDtypeStruct((B, T, C), compute_dtype)
                        for _ in range(3)),
        grid_spec=pltpu.PrefetchScalarGridSpec(
            num_scalar_prefetch=0,
            grid=(B, T // tt),
            in_specs=[
                pl.BlockSpec((1, tt, C), lambda b, t: (b, t, 0)),   # x tile
                pl.BlockSpec((1, 1, C), lambda b, t: (b, 0, 0)),    # per-batch scale
                pl.BlockSpec((1, 1, C), lambda b, t: (b, 0, 0)),    # per-batch shift
                pl.BlockSpec((C, 3 * C), lambda b, t: (0, 0)),      # fused wqkv
                pl.BlockSpec((1, 3 * C), lambda b, t: (0, 0)),      # fused bqkv
            ],
            out_specs=tuple(
                pl.BlockSpec((1, tt, C), lambda b, t: (b, t, 0)) for _ in range(3)),
        ),
        compiler_params=pltpu.CompilerParams(
            dimension_semantics=("parallel", "parallel"),
            vmem_limit_bytes=vmem_limit),
    )(x_btc, scale_c, shift_c, wqkv, bqkv)

    # ------------- Kernel 2: flash attention + out proj + residual --------------
    out_btc = pl.pallas_call(
        functools.partial(_flash_attn_kernel, approx_recip=approx_recip),
        out_shape=jax.ShapeDtypeStruct((B, T, C), jnp.float32),
        grid_spec=pltpu.PrefetchScalarGridSpec(
            num_scalar_prefetch=0,
            grid=(B, T // tq, T // tkv),
            in_specs=[
                pl.BlockSpec((1, tq, C), lambda b, qi, ki: (b, qi, 0)),    # q tile
                pl.BlockSpec((1, tkv, C), lambda b, qi, ki: (b, ki, 0)),   # k tile
                pl.BlockSpec((1, tkv, C), lambda b, qi, ki: (b, ki, 0)),   # v tile
                pl.BlockSpec((1, tq, C), lambda b, qi, ki: (b, qi, 0)),    # residual x
                pl.BlockSpec((C, C), lambda b, qi, ki: (0, 0)),            # wo
                pl.BlockSpec((1, C), lambda b, qi, ki: (0, 0)),            # bo
            ],
            out_specs=pl.BlockSpec((1, tq, C), lambda b, qi, ki: (b, qi, 0)),
            scratch_shapes=[
                pltpu.VMEM((tq, 1), jnp.float32),    # running max m
                pltpu.VMEM((tq, 1), jnp.float32),    # running sum l
                pltpu.VMEM((tq, C), jnp.float32),    # output accumulator
            ],
        ),
        compiler_params=pltpu.CompilerParams(
            dimension_semantics=("parallel", "parallel", "arbitrary"),
            vmem_limit_bytes=vmem_limit),
    )(q, k, v, x_btc, wo, bo)

    # (B, T, C) -> NCHW
    return jnp.transpose(out_btc.reshape(B, H, W, C), (0, 3, 1, 2))


# ----------------------------------------------------------------------------
# Pure-JAX reference matching the PyTorch forward pass
# ----------------------------------------------------------------------------
def attention_reference(x_nchw, params, num_groups):
    B, C, H, W = x_nchw.shape
    T = H * W
    eps = 1e-5
    resid = x_nchw

    xg = x_nchw.reshape(B, num_groups, C // num_groups, H, W)
    mean = jnp.mean(xg, axis=(2, 3, 4), keepdims=True)
    var = jnp.mean((xg - mean) ** 2, axis=(2, 3, 4), keepdims=True)
    xn = ((xg - mean) / jnp.sqrt(var + eps)).reshape(B, C, H, W)
    xn = xn * params["gn_gamma"].reshape(1, C, 1, 1) + params["gn_beta"].reshape(1, C, 1, 1)

    def conv1x1(z, w, b):
        return jnp.einsum("oc,bchw->bohw", w.reshape(C, C), z) + b.reshape(1, C, 1, 1)

    q = conv1x1(xn, params["wq"], params["bq"])
    k = conv1x1(xn, params["wk"], params["bk"])
    v = conv1x1(xn, params["wv"], params["bv"])

    q = q.reshape(B, C, T).transpose(0, 2, 1)
    k = k.reshape(B, C, T).transpose(0, 2, 1)
    v = v.reshape(B, C, T).transpose(0, 2, 1)

    w = jnp.einsum("btc,bsc->bts", q, k) / math.sqrt(C)
    scores = jax.nn.softmax(w, axis=-1)
    attn = jnp.einsum("bts,bsc->btc", scores, v)

    out2d = attn.transpose(0, 2, 1).reshape(B, C, H, W)
    out2d = conv1x1(out2d, params["wo"], params["bo"])
    return out2d + resid


if __name__ == "__main__":
    B, C, H, W = 2, 128, 8, 8
    num_groups = 8

    key = jax.random.PRNGKey(0)
    keys = jax.random.split(key, 12)

    x = jax.random.normal(keys[0], (B, C, H, W), dtype=jnp.float32)

    params = {
        "gn_gamma": 1.0 + 0.1 * jax.random.normal(keys[1], (C,), dtype=jnp.float32),
        "gn_beta": 0.1 * jax.random.normal(keys[2], (C,), dtype=jnp.float32),
        "wq": jax.random.normal(keys[3], (C, C, 1, 1), dtype=jnp.float32) / math.sqrt(C),
        "bq": 0.05 * jax.random.normal(keys[4], (C,), dtype=jnp.float32),
        "wk": jax.random.normal(keys[5], (C, C, 1, 1), dtype=jnp.float32) / math.sqrt(C),
        "bk": 0.05 * jax.random.normal(keys[6], (C,), dtype=jnp.float32),
        "wv": jax.random.normal(keys[7], (C, C, 1, 1), dtype=jnp.float32) / math.sqrt(C),
        "bv": 0.05 * jax.random.normal(keys[8], (C,), dtype=jnp.float32),
        "wo": jax.random.normal(keys[9], (C, C, 1, 1), dtype=jnp.float32) / math.sqrt(C),
        "bo": 0.05 * jax.random.normal(keys[10], (C,), dtype=jnp.float32),
    }

    ref = jax.block_until_ready(attention_reference(x, params, num_groups))

    # Exact-semantics check: f32 compute path, tight tolerance.
    out_f32 = jax.block_until_ready(
        attention_pallas(x, params, num_groups, compute_dtype=jnp.float32))
    np.testing.assert_allclose(np.asarray(out_f32), np.asarray(ref),
                               rtol=1e-4, atol=1e-4)

    # Performance path: bf16 MXU operands (f32 accumulation / stats), loose tolerance.
    out_bf16 = jax.block_until_ready(
        attention_pallas(x, params, num_groups, compute_dtype=jnp.bfloat16))
    np.testing.assert_allclose(np.asarray(out_bf16), np.asarray(ref),
                               rtol=5e-2, atol=1e-1)

    print("KERNEL_OK")
</pallas_src>

<mosaic_0001>
module attributes {stable_mosaic.version = 11 : i64} {
  func.func @_qkv_proj_kernel(%arg0: i32, %arg1: i32, %arg2: memref<1x64x128xf32, #tpu.memory_space<vmem>>, %arg3: memref<1x1x128xf32, #tpu.memory_space<vmem>>, %arg4: memref<1x1x128xf32, #tpu.memory_space<vmem>>, %arg5: memref<128x384xf32, #tpu.memory_space<vmem>>, %arg6: memref<1x384xf32, #tpu.memory_space<vmem>>, %arg7: memref<1x64x128xf32, #tpu.memory_space<vmem>>, %arg8: memref<1x64x128xf32, #tpu.memory_space<vmem>>, %arg9: memref<1x64x128xf32, #tpu.memory_space<vmem>>) attributes {dimension_semantics = [#tpu.dimension_semantics<parallel>, #tpu.dimension_semantics<parallel>], iteration_bounds = array<i64: 2, 1>, scalar_prefetch = 0 : i64, scratch_operands = 0 : i64, tpu.core_type = #tpu.core_type<tc>, window_params = [{transform_indices = @transform_0, window_bounds = array<i64: 1, 64, 128>}, {transform_indices = @transform_1, window_bounds = array<i64: 1, 1, 128>}, {transform_indices = @transform_2, window_bounds = array<i64: 1, 1, 128>}, {pipeline_mode = #tpu.pipeline_mode<synchronous>, transform_indices = @transform_3, window_bounds = array<i64: 128, 384>}, {pipeline_mode = #tpu.pipeline_mode<synchronous>, transform_indices = @transform_4, window_bounds = array<i64: 1, 384>}, {transform_indices = @transform_5, window_bounds = array<i64: 1, 64, 128>}, {transform_indices = @transform_6, window_bounds = array<i64: 1, 64, 128>}, {transform_indices = @transform_7, window_bounds = array<i64: 1, 64, 128>}]} {
    %c0 = arith.constant 0 : index
    %c0_0 = arith.constant 0 : index
    %c0_1 = arith.constant 0 : index
    %0 = vector.load %arg2[%c0, %c0_0, %c0_1] : memref<1x64x128xf32, #tpu.memory_space<vmem>>, vector<1x64x128xf32>
    %1 = vector.shape_cast %0 : vector<1x64x128xf32> to vector<64x128xf32>
    %c0_2 = arith.constant 0 : index
    %c0_3 = arith.constant 0 : index
    %c0_4 = arith.constant 0 : index
    %2 = vector.load %arg3[%c0_2, %c0_3, %c0_4] : memref<1x1x128xf32, #tpu.memory_space<vmem>>, vector<1x1x128xf32>
    %3 = vector.shape_cast %2 : vector<1x1x128xf32> to vector<1x128xf32>
    %4 = vector.broadcast %3 : vector<1x128xf32> to vector<64x128xf32>
    %5 = arith.mulf %1, %4 : vector<64x128xf32>
    %c0_5 = arith.constant 0 : index
    %c0_6 = arith.constant 0 : index
    %c0_7 = arith.constant 0 : index
    %6 = vector.load %arg4[%c0_5, %c0_6, %c0_7] : memref<1x1x128xf32, #tpu.memory_space<vmem>>, vector<1x1x128xf32>
    %7 = vector.shape_cast %6 : vector<1x1x128xf32> to vector<1x128xf32>
    %8 = vector.broadcast %7 : vector<1x128xf32> to vector<64x128xf32>
    %9 = arith.addf %5, %8 : vector<64x128xf32>
    %c0_8 = arith.constant 0 : index
    %c0_9 = arith.constant 0 : index
    %10 = vector.load %arg5[%c0_8, %c0_9] : memref<128x384xf32, #tpu.memory_space<vmem>>, vector<128x384xf32>
    %cst = arith.constant dense<0.000000e+00> : vector<64x384xf32>
    %11 = tpu.matmul %9, %10, %cst {dimension_numbers = #tpu.dot_dimension_numbers<[1], [0], [0], [1], [0, 0, 1, 1], [], []>} : vector<64x128xf32>, vector<128x384xf32>, vector<64x384xf32> -> vector<64x384xf32>
    %c0_10 = arith.constant 0 : index
    %c0_11 = arith.constant 0 : index
    %12 = vector.load %arg6[%c0_10, %c0_11] : memref<1x384xf32, #tpu.memory_space<vmem>>, vector<1x384xf32>
    %13 = vector.broadcast %12 : vector<1x384xf32> to vector<64x384xf32>
    %14 = arith.addf %11, %13 : vector<64x384xf32>
    %15 = vector.extract_strided_slice %14 {offsets = [0, 0], sizes = [64, 128], strides = [1, 1]} : vector<64x384xf32> to vector<64x128xf32>
    %c0_12 = arith.constant 0 : index
    %c0_13 = arith.constant 0 : index
    %c0_14 = arith.constant 0 : index
    %16 = vector.load %arg7[%c0_12, %c0_13, %c0_14] : memref<1x64x128xf32, #tpu.memory_space<vmem>>, vector<1x64x128xf32>
    %17 = vector.shape_cast %16 : vector<1x64x128xf32> to vector<64x128xf32>
    %18 = vector.shape_cast %15 : vector<64x128xf32> to vector<1x64x128xf32>
    tpu.vector_store %arg7[%c0_12, %c0_13, %c0_14], %18 {strides = array<i32>} : memref<1x64x128xf32, #tpu.memory_space<vmem>>, vector<1x64x128xf32>,
    %19 = vector.extract_strided_slice %14 {offsets = [0, 128], sizes = [64, 128], strides = [1, 1]} : vector<64x384xf32> to vector<64x128xf32>
    %c0_15 = arith.constant 0 : index
    %c0_16 = arith.constant 0 : index
    %c0_17 = arith.constant 0 : index
    %20 = vector.load %arg8[%c0_15, %c0_16, %c0_17] : memref<1x64x128xf32, #tpu.memory_space<vmem>>, vector<1x64x128xf32>
    %21 = vector.shape_cast %20 : vector<1x64x128xf32> to vector<64x128xf32>
    %22 = vector.shape_cast %19 : vector<64x128xf32> to vector<1x64x128xf32>
    tpu.vector_store %arg8[%c0_15, %c0_16, %c0_17], %22 {strides = array<i32>} : memref<1x64x128xf32, #tpu.memory_space<vmem>>, vector<1x64x128xf32>,
    %23 = vector.extract_strided_slice %14 {offsets = [0, 256], sizes = [64, 128], strides = [1, 1]} : vector<64x384xf32> to vector<64x128xf32>
    %c0_18 = arith.constant 0 : index
    %c0_19 = arith.constant 0 : index
    %c0_20 = arith.constant 0 : index
    %24 = vector.load %arg9[%c0_18, %c0_19, %c0_20] : memref<1x64x128xf32, #tpu.memory_space<vmem>>, vector<1x64x128xf32>
    %25 = vector.shape_cast %24 : vector<1x64x128xf32> to vector<64x128xf32>
    %26 = vector.shape_cast %23 : vector<64x128xf32> to vector<1x64x128xf32>
    tpu.vector_store %arg9[%c0_18, %c0_19, %c0_20], %26 {strides = array<i32>} : memref<1x64x128xf32, #tpu.memory_space<vmem>>, vector<1x64x128xf32>,
    return
  }
  func.func @transform_0(%arg0: i32, %arg1: i32) -> (i32, i32, i32) {
    %c0_i32 = arith.constant 0 : i32
    %c0_i32_0 = arith.constant 0 : i32
    return %arg0, %arg1, %c0_i32 : i32, i32, i32
  }
  func.func @transform_1(%arg0: i32, %arg1: i32) -> (i32, i32, i32) {
    %c0_i32 = arith.constant 0 : i32
    %c0_i32_0 = arith.constant 0 : i32
    %c0_i32_1 = arith.constant 0 : i32
    return %arg0, %c0_i32, %c0_i32_0 : i32, i32, i32
  }
  func.func @transform_2(%arg0: i32, %arg1: i32) -> (i32, i32, i32) {
    %c0_i32 = arith.constant 0 : i32
    %c0_i32_0 = arith.constant 0 : i32
    %c0_i32_1 = arith.constant 0 : i32
    return %arg0, %c0_i32, %c0_i32_0 : i32, i32, i32
  }
  func.func @transform_3(%arg0: i32, %arg1: i32) -> (i32, i32) {
    %c0_i32 = arith.constant 0 : i32
    %c0_i32_0 = arith.constant 0 : i32
    %c0_i32_1 = arith.constant 0 : i32
    return %c0_i32, %c0_i32_0 : i32, i32
  }
  func.func @transform_4(%arg0: i32, %arg1: i32) -> (i32, i32) {
    %c0_i32 = arith.constant 0 : i32
    %c0_i32_0 = arith.constant 0 : i32
    %c0_i32_1 = arith.constant 0 : i32
    return %c0_i32, %c0_i32_0 : i32, i32
  }
  func.func @transform_5(%arg0: i32, %arg1: i32) -> (i32, i32, i32) {
    %c0_i32 = arith.constant 0 : i32
    %c0_i32_0 = arith.constant 0 : i32
    return %arg0, %arg1, %c0_i32 : i32, i32, i32
  }
  func.func @transform_6(%arg0: i32, %arg1: i32) -> (i32, i32, i32) {
    %c0_i32 = arith.constant 0 : i32
    %c0_i32_0 = arith.constant 0 : i32
    return %arg0, %arg1, %c0_i32 : i32, i32, i32
  }
  func.func @transform_7(%arg0: i32, %arg1: i32) -> (i32, i32, i32) {
    %c0_i32 = arith.constant 0 : i32
    %c0_i32_0 = arith.constant 0 : i32
    return %arg0, %arg1, %c0_i32 : i32, i32, i32
  }
}

</mosaic_0001>

<bundles_post_ra>
// kernel: tpu_custom_call.1
= control target key start
LH: loop header
LB: loop body
LE: loop exit
PB: predicated region body
PF: predicated region fallthrough
CT: control target
= control target key end

     0   :  { %s1887_s0 = inlined_call_operand.hbm [shape: f32[2,64,128], index: 0, kind: input, shape index: {}]   ;;  %s1888_s1 = inlined_call_operand.vmem [shape: f32[2,1,128], index: 1, kind: input, shape index: {}]   ;;  %s1889_s2 = inlined_call_operand.vmem [shape: f32[2,1,128], index: 2, kind: input, shape index: {}]   ;;  %s1890_s3 = inlined_call_operand.hbm [shape: f32[128,384], index: 3, kind: input, shape index: {}]   ;;  %s1891_s4 = inlined_call_operand.vmem [shape: f32[1,384], index: 4, kind: input, shape index: {}]   ;;  %s1892_s5 = inlined_call_operand.hbm [shape: f32[2,64,128], index: 5, kind: output, shape index: {0}]   ;;  %s1893_s6 = inlined_call_operand.hbm [shape: f32[2,64,128], index: 6, kind: output, shape index: {1}]   ;;  %s1894_s7 = inlined_call_operand.hbm [shape: f32[2,64,128], index: 7, kind: output, shape index: {2}]  }
   0x1   :  { %1899 = sst [smem:[#allocation15_spill]] %s1887_s0 }
   0x2   :  { %1900 = sst [smem:[#allocation16_spill]] %s1888_s1 }
   0x3   :  { %1901 = sst [smem:[#allocation17_spill]] %s1889_s2 }
   0x4   :  { %1902 = sst [smem:[#allocation18_spill]] %s1890_s3 }
   0x5   :  { %1903 = sst [smem:[#allocation19_spill]] %s1891_s4 }
   0x6   :  { %13 = vsyncpa [#allocation3], 0 }
   0x7   :  { %15 = vsyncpa [#allocation3 + $0x1], 0 }
   0x8   :  { %16 = vsyncpa [#allocation6], 0 }
   0x9   :  { %17 = vsyncpa [#allocation4], 0 }
   0xa   :  { %19 = vsyncpa [#allocation4 + $0x1], 0 }
   0xb   :  { %20 = vsyncpa [#allocation9], 0 }
   0xc   :  { %22 = vsyncpa [#allocation9 + $0x1], 0  ;;  %s1484_s24 = smov 0   ;;  %s1486_s25 = smov 0  }
   0xd   :  { %s1488_s26 = smov 0   ;;  %s1490_s27 = smov 0  }
   0xe   :  { %s1492_s28 = smov 0   ;;  %s1494_s29 = smov 0  }
   0xf LB: > { %s1515_s30 = sadd.s32 4294967295, %s1430_s29   ;;  %s1898_s8 = sadd.s32 4294967294, %s1430_s29   ;;  %s1430_s29 = sphi %s1494_s29, %s28_s29   ;;  %s1426_s28 = sphi %s1492_s28, %s1929_s28   ;;  %s1422_s27 = sphi %s1490_s27, %s1928_s27   ;;  %s1418_s26 = sphi %s1488_s26, %s1927_s26   ;;  %s1414_s25 = sphi %s1486_s25, %s1926_s25   ;;  %s1410_s24 = sphi %s1484_s24, %s1925_s24  }
  0x10   : > { %p62_p0 = scmp.ne.s32.totalorder %s1414_s25, %s1410_s24  ;;  %p1895_p1 = scmp.eq.s32.totalorder %s1515_s30, 0 }
  0x11   : > { %p188_p3 = scmp.eq.s32.totalorder %s1898_s8, 1  ;;  %p975_p5 = scmp.ge.s32.totalorder %s1430_s29, 1 }
  0x12   : > { %p1526_p4 = por %p1895_p1, %p62_p0  ;;  %p251_p7 = scmp.lt.s32.totalorder %s1430_s29, 3 }
  0x13   : > { %p1531_p6 = por %p188_p3, %p62_p0  ;;  %s1432_s12 = smov [#allocation5]  }
  0x14   : > { %s1904_s9 = scalar_select %p1526_p4, 1, 0 }
  0x15   : > { %s1905_s10 = scalar_select %p1531_p6, 1, 0 }
  0x16   : > { %p1536_p8 = pnand %p975_p5, %p251_p7  ;;  %s263_s13 = sshll.u32 %s1432_s12, 4  ;;  %s264_s13 = int_to_ptr.vmem [resolvable:$true] %s263_s13 }
  0x17   : > { %s40_s15 = sadd.s32 1, %s1426_s28  ;;  %s1908_s3 = sld [smem:[#allocation18_spill]] }
  0x18   : > { %s1906_s11 = scalar_select %p1536_p8, 1, 0 }
  0x19   : > { %p1148_p9 = pneg %p1536_p8 }
  0x1b   : > { %p1545_p11 = pnand %p1148_p9, %p1895_p1 }
  0x1d   : > { %s1226_s18 = scalar_lea.hbm %s1908_s3, 6144  ;;  %p1228_p13 = pneg %p1545_p11 }
  0x1e   : > { %p1227_p12 = scmp.ne.s32.totalorder %s1908_s3, %s1226_s18  ;;  %p1233_p5 = scmp.lt.u32.totalorder %s1226_s18, %s1908_s3 }
  0x20   : > { %p1229_p0 = pnand %p1228_p13, %p1227_p12 }
  0x22   : > { %p1230_p3 = pneg %p1229_p0 }
  0x24   : > { %p1235_p7 = pnand %p1233_p5, %p1230_p3 }
  0x26   : > { %1238 = shalt.err (!%p1235_p7)
}
  0x27   : > { %s1239_s23 = scalar_lea.vmem %s264_s13, 6144  ;;  %p1247_p2 = scmp.lt.s32.totalorder %s264_s13, %s264_s13 }
  0x28   : > { %p1240_p9 = scmp.ne.s32.totalorder %s264_s13, %s1239_s23  ;;  %p1248_p6 = scmp.lt.s32.totalorder %s1239_s23, %s1239_s23 }
  0x2a   : > { %p1242_p10 = pnand %p1240_p9, %p1228_p13  ;;  %p1249_p4 = por %p1248_p6, %p1247_p2 }
  0x2c   : > { %p1243_p1 = pneg %p1242_p10 }
  0x2e   : > { %p1250_p8 = pnand %p1249_p4, %p1243_p1 }
  0x30   : > { %1253 = shalt.err (!%p1250_p8)
}
  0x31   : > { %s1433_s12 = smov 384   ;;  %s1434_s16 = smov 24  }
  0x32   : > { %1151 = dma.hbm_to_vmem [thread:$0]  (!%p1545_p11), %s1908_s3, 6144, %s264_s13, [#allocation6], %s1433_s12, %s1433_s12, %s1434_s16  }
  0x33   : > { %p42_p1 = scmp.ge.s32.totalorder %s40_s15, 2  ;;  %s49_s19 = sadd.s32 1, %s1418_s26 }
  0x34   : > { %p56_p2 = scmp.ne.s32.totalorder %s1418_s26, %s1414_s25  ;;  %p57_p4 = scmp.eq.s32.totalorder %s1430_s29, 0 }
  0x35   : > { %s1931_s15 = smov (%p42_p1, %s40_s15), 0  ;;  %p1910_p8 = scmp.eq.s32.totalorder %s1515_s30, 1 }
  0x36   : > { %p1572_p6 = por %p57_p4, %p56_p2  ;;  %s44_s14 = ssub.s32 %s1426_s28, %s1931_s15 }
  0x37   : > { %p1578_p10 = por %p1910_p8, %p56_p2  ;;  %p1167_p12 = scmp.lt.s32.totalorder %s1430_s29, 2 }
  0x38   : > { %p47_p11 = scmp.eq.s32.totalorder %s44_s14, 0  ;;  %s280_s13 = sand.u32 1, %s1418_s26  }
  0x39   : > { %s978_s22 = sshll.u32 %s280_s13, 6  ;;  %s1000_s12 = sshll.u32 %s1426_s28, 10 }
  0x3a   : > { %s1587_s23 = scalar_select %p47_p11, %s1418_s26, %s49_s19  }
  0x3b   : > { %s1912_s0 = sld [smem:[#allocation15_spill]]  ;;  %s284_s8 = scalar_lea.vmem [#allocation2], %s978_s22 }
  0x3c   : > { %s293_s3 = sshll.u32 %s284_s8, 4  ;;  %p1599_p13 = pnand %p1167_p12, %p1572_p6  ;;  %s1595_s3 = int_to_ptr.vmem [resolvable:$true] %s293_s3 }
  0x3d   : > { %s1603_s19 = scalar_lea.sflag [#allocation3], %s280_s13 }
  0x3e   : > { %p1256_p3 = pneg %p1599_p13 }
  0x41   : > { %s1593_s18 = scalar_lea.hbm %s1912_s0, %s1000_s12  ;;  %s1259_s20 = scalar_lea.hbm %s1912_s0, 2048 }
  0x42   : > { %s1254_s16 = scalar_lea.hbm %s1593_s18, 1024  ;;  %p1260_p9 = scmp.lt.u32.totalorder %s1593_s18, %s1912_s0 }
  0x43   : > { %p1255_p0 = scmp.ne.s32.totalorder %s1593_s18, %s1254_s16  ;;  %p1261_p1 = scmp.lt.u32.totalorder %s1259_s20, %s1254_s16 }
  0x44   : > { %p1263_p4 = scmp.lt.u32.totalorder %s1254_s16, %s1593_s18 }
  0x45   : > { %p1257_p5 = pnand %p1256_p3, %p1255_p0  ;;  %p1262_p2 = por %p1261_p1, %p1260_p9 }
  0x47   : > { %p1258_p7 = pneg %p1257_p5  ;;  %p1264_p6 = por %p1263_p4, %p1262_p2 }
  0x49   : > { %p1265_p8 = pnand %p1264_p6, %p1258_p7 }
  0x4b   : > { %1268 = shalt.err (!%p1265_p8)
}
  0x4c   : > { %s1269_s13 = scalar_lea.vmem %s1595_s3, 1024  ;;  %s1435_s8 = smov [#allocation2]  }
  0x4d   : > { %p1270_p12 = scmp.ne.s32.totalorder %s1595_s3, %s1269_s13  ;;  %s1274_s22 = sshll.u32 %s1435_s8, 4  ;;  %s1275_s22 = int_to_ptr.vmem [resolvable:$false] %s1274_s22 }
  0x4e   : > { %s1276_s12 = scalar_lea.vmem %s1275_s22, 2048  ;;  %p1277_p5 = scmp.lt.s32.totalorder %s1595_s3, %s1275_s22 }
  0x4f   : > { %p1272_p11 = pnand %p1270_p12, %p1256_p3  ;;  %p1278_p9 = scmp.lt.s32.totalorder %s1276_s12, %s1269_s13 }
  0x51   : > { %p1273_p0 = pneg %p1272_p11  ;;  %p1279_p1 = por %p1278_p9, %p1277_p5 }
  0x53   : > { %p1280_p2 = pnand %p1279_p1, %p1273_p0 }
  0x55   : > { %1283 = shalt.err (!%p1280_p2)
}
  0x56   : > { %s1436_s16 = smov 128   ;;  %s1437_s20 = smov 8  }
  0x57   : > { %1155 = dma.hbm_to_vmem [thread:$0]  (!%p1599_p13), %s1593_s18, 1024, %s1595_s3, %s1603_s19, %s1436_s16, %s1436_s16, %s1437_s20  }
  0x58   : > { %p1914_p3 = scmp.ne.s32.totalorder %s1906_s11, 0 }
  0x59   : > { %s1634_s17 = sand.u32 (!%p1914_p3), 1, %s1414_s25   ;;  %p1915_p7 = scmp.ne.s32.totalorder (!%p1914_p3), %s1904_s9, 0 }
  0x5a   : > { %317 = sbr.rel (%p1914_p3) target bundleno = 440 (0x1b8), region = 40  ;;  %s1637_s13 = sshll.u32 (!%p1914_p3), %s1634_s17, 6 }
  0x5b   : > { %s320_s8 = scalar_lea.sflag (!%p1914_p3), [#allocation3], %s1634_s17  ;;  %s1641_s22 = scalar_lea.vmem (!%p1914_p3), [#allocation2], %s1637_s13 }
  0x61   : > { %1393 = dma.done.wait (%p1915_p7), %s320_s8, 1024  }
  0x62   : > { %1395 = vsyncadd (%p1915_p7), %s320_s8, 4294966272  ;;  %p1916_p13 = scmp.eq.s32.totalorder %s1515_s30, 0 }
  0x64   : > { %1397 = dma.done.wait (%p1916_p13), [#allocation6], 6144   ;;  %p1917_p4 = pmov %p1916_p13 }
  0x65   : > { %v1438_v0 = vmov 0.0   ;;  %v423_v1 = vld [vmem:[#allocation5 + $0x8] sm:$0xff]  ;;  %v426_v2 = vld [vmem:[#allocation5 + $0x20] sm:$0xff]  ;;  %v425_v5 = vld [vmem:[#allocation5 + $0x18] sm:$0xff]  ;;  %p375_p6 = scmp.lt.s32.totalorder %s1422_s27, 1  ;;  %s1918_s1 = sld [smem:[#allocation16_spill]] }
  0x66   : > { %1399 = vsyncadd (%p1917_p4), [#allocation6], 4294961152  ;;  %551 = vmatprep.mubr.f32.mxu0 %v1438_v0  ;;  %v422_v3 = vld [vmem:[#allocation5] sm:$0xff]  ;;  %v1072_v4 = vpack.c.bf16 %v426_v2, %v423_v1  ;;  %v429_v6 = vld [vmem:[#allocation5 + $0x38] sm:$0xff]  ;;  %s1919_s2 = sld [smem:[#allocation17_spill]]  ;;  %s1920_s4 = sld [smem:[#allocation19_spill]] }
  0x67   : > { %v432_v7 = vld [vmem:[#allocation5 + $0x50] sm:$0xff]  ;;  %v1074_v8 = vpack.c.bf16 %v425_v5, %v422_v3  ;;  %v431_v11 = vld [vmem:[#allocation5 + $0x48] sm:$0xff]  ;;  %v438_v13 = vld [vmem:[#allocation5 + $0x80] sm:$0xff]  ;;  %s1654_s3 = scalar_select %p375_p6, %s1422_s27, 1 }
  0x68   : > { %v1076_v9 = vpack.c.bf16 %v432_v7, %v429_v6  ;;  %v428_v10 = vld [vmem:[#allocation5 + $0x30] sm:$0xff]  ;;  %v435_v12 = vld [vmem:[#allocation5 + $0x68] sm:$0xff]  ;;  %1073 = vmatprep.subr.bf16.mxu0 %v1072_v4  ;;  %v434_v16 = vld [vmem:[#allocation5 + $0x60] sm:$0xff]  ;;  %s1709_s8 = scalar_lea.vmem [#allocation7], %s1637_s13  ;;  %s1001_s11 = sshll.u32 %s1422_s27, 10 }
  0x69   : > { %1075 = vmatpush1.bf16.msra.mxu0 %v1074_v8  ;;  %v1078_v14 = vpack.c.bf16 %v431_v11, %v428_v10  ;;  %v1080_v15 = vpack.c.bf16 %v438_v13, %v435_v12  ;;  %v437_v17 = vld [vmem:[#allocation5 + $0x78] sm:$0xff]  ;;  %v444_v19 = vld [vmem:[#allocation5 + $0xb0] sm:$0xff]  ;;  %v427_v21 = vld [vmem:[#allocation5 + $0x28] sm:$0xff]  ;;  %s1764_s16 = scalar_lea.hbm %s1892_s5, %s1001_s11  ;;  %s730_s19 = scalar_lea.sflag [#allocation4], %s1634_s17 }
  0x6a   : > { %1077 = vmatprep.subr.bf16.mxu0 %v1076_v9  ;;  %v441_v18 = vld [vmem:[#allocation5 + $0x98] sm:$0xff]  ;;  %v424_v20 = vld [vmem:[#allocation5 + $0x10] sm:$0xff]  ;;  %v1082_v23 = vpack.c.bf16 %v437_v17, %v434_v16  ;;  %v430_v24 = vld [vmem:[#allocation5 + $0x40] sm:$0xff] }
  0x6b   : > { %v1104_v22 = vpack.c.bf16 %v427_v21, %v424_v20  ;;  %v433_v25 = vld [vmem:[#allocation5 + $0x58] sm:$0xff]  ;;  %v1084_v26 = vpack.c.bf16 %v444_v19, %v441_v18  ;;  %v440_v27 = vld [vmem:[#allocation5 + $0x90] sm:$0xff]  ;;  %v443_v28 = vld [vmem:[#allocation5 + $0xa8] sm:$0xff]  ;;  %s377_s18 = scalar_lea.vmem %s1918_s1, %s1654_s3  ;;  %s1778_s1 = scalar_lea.hbm %s1894_s7, %s1001_s11 }
  0x6c   : > { %v447_v29 = vld [vmem:[#allocation5 + $0xc8] sm:$0xff]  ;;  %v1108_v30 = vpack.c.bf16 %v433_v25, %v430_v24  ;;  %v450_v31 = vld [vmem:[#allocation5 + $0xe0] sm:$0xff]  ;;  %v436_v32 = vld [vmem:[#allocation5 + $0x70] sm:$0xff]  ;;  %s380_s12 = scalar_lea.vmem %s1919_s2, %s1654_s3  ;;  %v1086_v35 = vpack.c.bf16 %v443_v28, %v440_v27  ;;  %s1722_s3 = scalar_lea.vmem [#allocation10], %s1637_s13 }
  0x6d   : > { %1079 = vmatpush1.bf16.msra.mxu0 %v1078_v14  ;;  %1105 = vmatprep.subr.bf16.mxu1 %v1104_v22  ;;  %v439_v33 = vld [vmem:[#allocation5 + $0x88] sm:$0xff]  ;;  %v446_v36 = vld [vmem:[#allocation5 + $0xc0] sm:$0xff]  ;;  %v445_v38 = vld [vmem:[#allocation5 + $0xb8] sm:$0xff]  ;;  %v1088_v39 = vpack.c.bf16 %v450_v31, %v447_v29  ;;  %s1439_s2 = smov [#allocation7]  }
  0x6e   : > { %1081 = vmatprep.subr.bf16.mxu0 %v1080_v15  ;;  %1107 = vmatpush3.bf16.msra.mxu1 %v1104_v22  ;;  %v1112_v34 = vpack.c.bf16 %v439_v33, %v436_v32  ;;  %v442_v37 = vld [vmem:[#allocation5 + $0xa0] sm:$0xff]  ;;  %v449_v40 = vld [vmem:[#allocation5 + $0xd8] sm:$0xff]  ;;  %v456_v44 = vld [vmem:[#allocation5 + $0x110] sm:$0xff] }
  0x6f   : > { %1109 = vmatprep.subr.bf16.mxu1 %v1108_v30  ;;  %v384_v41 = vld [vmem:[%s1641_s22] sm:$0xff]  ;;  %v453_v43 = vld [vmem:[#allocation5 + $0xf8] sm:$0xff]  ;;  %v1116_v47 = vpack.c.bf16 %v445_v38, %v442_v37  ;;  %v1090_v48 = vpack.c.bf16 %v449_v40, %v446_v36  ;;  %v448_v50 = vld [vmem:[#allocation5 + $0xd0] sm:$0xff]  ;;  %v472_v36 = vlaneseq }
  0x70   : > { %v1665_v42 = vld [vmem:[%s377_s18] ss:$0 sm:$0xff]  ;;  %v451_v51 = vld [vmem:[#allocation5 + $0xe8] sm:$0xff]  ;;  %v1092_v52 = vpack.c.bf16 %v456_v44, %v453_v43  ;;  %v452_v53 = vld [vmem:[#allocation5 + $0xf0] sm:$0xff]  ;;  %s791_s18 = sshll.u32 %s1722_s3, 4  ;;  %s1772_s18 = int_to_ptr.vmem [resolvable:$true] %s791_s18 }
  0x71   : > { %1083 = vmatpush1.bf16.msra.mxu0 %v1082_v23  ;;  %v399_v45 = vmul.f32 %v1665_v42, %v384_v41  ;;  %v1668_v46 = vld [vmem:[%s380_s12] ss:$0 sm:$0xff]  ;;  %v455_v54 = vld [vmem:[#allocation5 + $0x108] sm:$0xff]  ;;  %v1120_v57 = vpack.c.bf16 %v451_v51, %v448_v50  ;;  %v457_v60 = vld [vmem:[#allocation5 + $0x118] sm:$0xff]  ;;  %v473_v37 = vshrl.u32 %v472_v36, 7 }
  0x72   : > { %1085 = vmatprep.subr.bf16.mxu0 %v1084_v26  ;;  %1111 = vmatpush3.bf16.msra.mxu1 %v1108_v30  ;;  %v459_v55 = vld [vmem:[#allocation5 + $0x128] sm:$0xff]  ;;  %v462_v56 = vld [vmem:[#allocation5 + $0x140] sm:$0xff]  ;;  %v1094_v58 = vpack.c.bf16 %v455_v54, %v452_v53  ;;  %v461_v63 = vld [vmem:[#allocation5 + $0x138] sm:$0xff] }
  0x73   : > { %1113 = vmatprep.subr.bf16.mxu1 %v1112_v34  ;;  %v414_v49 = vadd.f32 %v1668_v46, %v399_v45  ;;  %v454_v59 = vld [vmem:[#allocation5 + $0x100] sm:$0xff]  ;;  %v1096_v61 = vpack.c.bf16 %v462_v56, %v459_v55  ;;  %v465_v1 = vld [vmem:[#allocation5 + $0x158] sm:$0xff]  ;;  %v468_v2 = vld [vmem:[#allocation5 + $0x170] sm:$0xff]  ;;  %v474_v38 = vsub.s32 0, %v473_v37  ;;  %v478_v40 = vsub.s32 1, %v473_v37 }
  0x74   : > { %v458_v62 = vld [vmem:[#allocation5 + $0x120] sm:$0xff]  ;;  %v1124_v3 = vpack.c.bf16 %v457_v60, %v454_v59  ;;  %v460_v5 = vld [vmem:[#allocation5 + $0x130] sm:$0xff]  ;;  %v463_v6 = vld [vmem:[#allocation5 + $0x148] sm:$0xff]  ;;  %v1100_v7 = vpack.c.bf16 %v468_v2, %v465_v1  ;;  %v482_v43 = vsub.s32 2, %v473_v37 }
  0x75   : > { %1087 = vmatpush1.bf16.msra.mxu0 %v1086_v35  ;;  %1060 = vmatprep.mubr.f32.mxu1 %v414_v49  ;;  %v1098_v4 = vpack.c.bf16 %v461_v63, %v458_v62  ;;  %v464_v8 = vld [vmem:[#allocation5 + $0x150] sm:$0xff]  ;;  %v467_v9 = vld [vmem:[#allocation5 + $0x168] sm:$0xff]  ;;  %v1128_v10 = vpack.c.bf16 %v463_v6, %v460_v5  ;;  %v466_v13 = vld [vmem:[#allocation5 + $0x160] sm:$0xff] }
  0x76   : > { %1089 = vmatprep.subr.bf16.mxu0 %v1088_v39  ;;  %1115 = vmatpush3.bf16.msra.mxu1 %v1112_v34  ;;  %v1102_v11 = vpack.c.bf16 %v467_v9, %v464_v8  ;;  %v385_v12 = vld [vmem:[%s1641_s22 + $0x8] sm:$0xff]  ;;  %v469_v14 = vld [vmem:[#allocation5 + $0x178] sm:$0xff]  ;;  %v386_v17 = vld [vmem:[%s1641_s22 + $0x10] sm:$0xff] }
  0x77   : > { %1117 = vmatprep.subr.bf16.mxu1 %v1116_v47  ;;  %v400_v15 = vmul.f32 %v1665_v42, %v385_v12  ;;  %v1132_v16 = vpack.c.bf16 %v469_v14, %v466_v13  ;;  %v401_v19 = vmul.f32 %v1665_v42, %v386_v17  ;;  %v387_v20 = vld [vmem:[%s1641_s22 + $0x18] sm:$0xff]  ;;  %v388_v21 = vld [vmem:[%s1641_s22 + $0x20] sm:$0xff]  ;;  %v389_v25 = vld [vmem:[%s1641_s22 + $0x28] sm:$0xff] }
  0x78   : > { %v402_v23 = vmul.f32 %v1665_v42, %v387_v20  ;;  %v403_v24 = vmul.f32 %v1665_v42, %v388_v21  ;;  %v390_v26 = vld [vmem:[%s1641_s22 + $0x30] sm:$0xff]  ;;  %v391_v27 = vld [vmem:[%s1641_s22 + $0x38] sm:$0xff]  ;;  %v404_v29 = vmul.f32 %v1665_v42, %v389_v25  ;;  %v470_v39 = vld [vmem:[%s1920_s4] sm:$0x7]  ;;  %s1713_s22 = scalar_lea.vmem [#allocation8], %s1637_s13  ;;  %s755_s13 = sshll.u32 %s1709_s8, 4  ;;  %s1749_s13 = int_to_ptr.vmem [resolvable:$true] %s755_s13 }
  0x79   : > { %1091 = vmatpush1.bf16.msra.mxu0 %v1090_v48  ;;  %v415_v18 = vadd.f32 %v1668_v46, %v400_v15  ;;  %v416_v22 = vadd.f32 %v1668_v46, %v401_v19  ;;  %v405_v31 = vmul.f32 %v1665_v42, %v390_v26  ;;  %v406_v32 = vmul.f32 %v1665_v42, %v391_v27  ;;  %s773_s9 = sshll.u32 %s1713_s22, 4  ;;  %s1284_s12 = scalar_lea.vmem %s1749_s13, 1024  ;;  %s1752_s9 = int_to_ptr.vmem [resolvable:$true] %s773_s9 }
  0x7a   : > { %1093 = vmatprep.subr.bf16.mxu0 %v1092_v52  ;;  %1119 = vmatpush3.bf16.msra.mxu1 %v1116_v47  ;;  %v417_v28 = vadd.f32 %v1668_v46, %v402_v23  ;;  %v418_v30 = vadd.f32 %v1668_v46, %v403_v24  ;;  %v419_v33 = vadd.f32 %v1668_v46, %v404_v29  ;;  %p1285_p8 = scmp.ne.s32.totalorder %s1749_s13, %s1284_s12  ;;  %s1288_s4 = sshll.u32 %s1439_s2, 4  ;;  %s1289_s4 = int_to_ptr.vmem [resolvable:$false] %s1288_s4 }
  0x7b   : > { %1121 = vmatprep.subr.bf16.mxu1 %v1120_v57  ;;  %v420_v34 = vadd.f32 %v1668_v46, %v405_v31  ;;  %v421_v35 = vadd.f32 %v1668_v46, %v406_v32  ;;  %v1702_v41 = vrot.slane %v470_v39, %v474_v38  ;;  %v1704_v42 = vrot.slane %v470_v39, %v478_v40  ;;  %s1290_s27 = scalar_lea.vmem %s1289_s4, 2048  ;;  %p1291_p0 = scmp.lt.s32.totalorder %s1749_s13, %s1289_s4 }
  0x7c   : > { %v483_v47 = vrot.slane %v470_v39, %v482_v43  ;;  %p1286_p12 = pnand %p1285_p8, %p1578_p10  ;;  %p1292_p5 = scmp.lt.s32.totalorder %s1290_s27, %s1284_s12 }
  0x7d   : > { %1095 = vmatpush1.bf16.msra.mxu0 %v1094_v58 }
  0x7e   : > { %1097 = vmatprep.subr.bf16.mxu0 %v1096_v61  ;;  %1123 = vmatpush3.bf16.msra.mxu1 %v1120_v57  ;;  %p1287_p11 = pneg %p1286_p12  ;;  %p1293_p9 = por %p1292_p5, %p1291_p0 }
  0x7f   : > { %1125 = vmatprep.subr.bf16.mxu1 %v1124_v3 }
  0x80   : > { %p1294_p1 = pnand %p1293_p9, %p1287_p11 }
  0x81   : > { %1099 = vmatpush1.bf16.msra.mxu0 %v1098_v4 }
  0x82   : > { %1101 = vmatprep.subr.bf16.mxu0 %v1100_v7  ;;  %1127 = vmatpush3.bf16.msra.mxu1 %v1124_v3 }
  0x83   : > { %1129 = vmatprep.subr.bf16.mxu1 %v1128_v10 }
  0x85   : > { %1103 = vmatpush1.bf16.msra.mxu0 %v1102_v11 }
  0x86   : > { %1131 = vmatpush3.bf16.msra.mxu1 %v1128_v10 }
  0x87   : > { %1133 = vmatprep.subr.bf16.mxu1 %v1132_v16 }
  0x88   : > { %552 = vmatmul.mubr.f32.vlgmr.msra.gmra.mrb[0].mxu0 %v414_v49 }
  0x89   : > { %557 = vmatprep.mubr.f32.mxu0 %v1438_v0 }
  0x8a   : > { %1135 = vmatpush3.bf16.msra.mxu1 %v1132_v16 }
  0x8c   : > { %558 = vmatmul.mubr.f32.gmra.mrb[2].mxu0 %v415_v18 }
  0x8d   : > { %563 = vmatprep.mubr.f32.mxu0 %v1438_v0  ;;  %1061 = vmatmul.mubr.f32.vlgmr.msra.gmra.mrb[0].mxu1 %v415_v18 }
  0x8e   : > { %1063 = vmatprep.mubr.f32.mxu1 %v416_v22 }
  0x90   : > { %564 = vmatmul.mubr.f32.gmra.mrb[4].mxu0 %v416_v22 }
  0x91   : > { %569 = vmatprep.mubr.f32.mxu0 %v1438_v0  ;;  %1064 = vmatmul.mubr.f32.gmra.mrb[2].mxu1 %v417_v28 }
  0x92   : > { %1066 = vmatprep.mubr.f32.mxu1 %v418_v30 }
  0x94   : > { %570 = vmatmul.mubr.f32.gmra.mrb[6].mxu0 %v417_v28 }
  0x95   : > { %575 = vmatprep.mubr.f32.mxu0 %v1438_v0  ;;  %1067 = vmatmul.mubr.f32.gmra.mrb[4].mxu1 %v419_v33 }
  0x96   : > { %1069 = vmatprep.mubr.f32.mxu1 %v420_v34 }
  0x98   : > { %576 = vmatmul.mubr.f32.gmra.mrb[8].mxu0 %v418_v30 }
  0x99   : > { %581 = vmatprep.mubr.f32.mxu0 %v1438_v0  ;;  %1070 = vmatmul.mubr.f32.gmra.mrb[6].mxu1 %v421_v35 }
  0x9c   : > { %582 = vmatmul.mubr.f32.gmra.mrb[10].mxu0 %v419_v33 }
  0x9d   : > { %587 = vmatprep.mubr.f32.mxu0 %v1438_v0 }
  0xa0   : > { %588 = vmatmul.mubr.f32.gmra.mrb[12].mxu0 %v420_v34 }
  0xa1   : > { %593 = vmatprep.mubr.f32.mxu0 %v1438_v0 }
  0xa4   : > { %594 = vmatmul.mubr.f32.gmra.mrb[14].mxu0 %v421_v35 }
 0x15b   : > { %v553_v44 = vpop.f32.mrb[0].mxu0 }
 0x15c   : > { %v554_v45 = vadd.f32 %v553_v44, %v1702_v41  ;;  %v555_v46 = vpop.f32.mrb[1].mxu0 }
 0x15d   : > { %v556_v0 = vadd.f32 %v555_v46, %v1704_v42 }
 0x15e   : > { %705 = vst [vmem:[%s1709_s8] sm:$0xff] %v554_v45 }
 0x15f   : > { %713 = vst [vmem:[%s1713_s22] sm:$0xff] %v556_v0  ;;  %v559_v48 = vpop.f32.mrb[2].mxu0 }
 0x160   : > { %v560_v49 = vadd.f32 %v559_v48, %v1702_v41  ;;  %v561_v50 = vpop.f32.mrb[3].mxu0  ;;  %v1062_v52 = vpop.f32.mrb[0].mxu1 }
 0x161   : > { %v562_v51 = vadd.f32 %v561_v50, %v1704_v42  ;;  %v672_v53 = vadd.f32 %v1062_v52, %v483_v47  ;;  %v666_v54 = vpop.f32.mrb[1].mxu1 }
 0x162   : > { %706 = vst [vmem:[%s1709_s8 + $0x8] sm:$0xff] %v560_v49  ;;  %v667_v56 = vadd.f32 %v666_v54, %v483_v47 }
 0x163   : > { %714 = vst [vmem:[%s1713_s22 + $0x8] sm:$0xff] %v562_v51  ;;  %v565_v55 = vpop.f32.mrb[4].mxu0  ;;  %722 = vst [vmem:[%s1722_s3 + $0x8] sm:$0xff] %v672_v53 }
 0x164   : > { %v566_v57 = vadd.f32 %v565_v55, %v1702_v41  ;;  %v567_v58 = vpop.f32.mrb[5].mxu0  ;;  %721 = vst [vmem:[%s1722_s3] sm:$0xff] %v667_v56  ;;  %v1065_v60 = vpop.f32.mrb[2].mxu1 }
 0x165   : > { %v568_v59 = vadd.f32 %v567_v58, %v1704_v42  ;;  %v682_v61 = vadd.f32 %v1065_v60, %v483_v47  ;;  %v676_v62 = vpop.f32.mrb[3].mxu1 }
 0x166   : > { %707 = vst [vmem:[%s1709_s8 + $0x10] sm:$0xff] %v566_v57  ;;  %v677_v1 = vadd.f32 %v676_v62, %v483_v47 }
 0x167   : > { %715 = vst [vmem:[%s1713_s22 + $0x10] sm:$0xff] %v568_v59  ;;  %v571_v63 = vpop.f32.mrb[6].mxu0  ;;  %724 = vst [vmem:[%s1722_s3 + $0x18] sm:$0xff] %v682_v61 }
 0x168   : > { %v572_v2 = vadd.f32 %v571_v63, %v1702_v41  ;;  %v573_v3 = vpop.f32.mrb[7].mxu0  ;;  %723 = vst [vmem:[%s1722_s3 + $0x10] sm:$0xff] %v677_v1  ;;  %v1068_v5 = vpop.f32.mrb[4].mxu1 }
 0x169   : > { %v574_v4 = vadd.f32 %v573_v3, %v1704_v42  ;;  %v692_v6 = vadd.f32 %v1068_v5, %v483_v47  ;;  %v686_v7 = vpop.f32.mrb[5].mxu1 }
 0x16a   : > { %708 = vst [vmem:[%s1709_s8 + $0x18] sm:$0xff] %v572_v2  ;;  %v687_v9 = vadd.f32 %v686_v7, %v483_v47 }
 0x16b   : > { %716 = vst [vmem:[%s1713_s22 + $0x18] sm:$0xff] %v574_v4  ;;  %v577_v8 = vpop.f32.mrb[8].mxu0  ;;  %726 = vst [vmem:[%s1722_s3 + $0x28] sm:$0xff] %v692_v6 }
 0x16c   : > { %v578_v10 = vadd.f32 %v577_v8, %v1702_v41  ;;  %v579_v11 = vpop.f32.mrb[9].mxu0  ;;  %725 = vst [vmem:[%s1722_s3 + $0x20] sm:$0xff] %v687_v9  ;;  %v1071_v13 = vpop.f32.mrb[6].mxu1 }
 0x16d   : > { %v580_v12 = vadd.f32 %v579_v11, %v1704_v42  ;;  %v702_v14 = vadd.f32 %v1071_v13, %v483_v47  ;;  %v696_v15 = vpop.f32.mrb[7].mxu1 }
 0x16e   : > { %709 = vst [vmem:[%s1709_s8 + $0x20] sm:$0xff] %v578_v10  ;;  %v697_v17 = vadd.f32 %v696_v15, %v483_v47 }
 0x16f   : > { %717 = vst [vmem:[%s1713_s22 + $0x20] sm:$0xff] %v580_v12  ;;  %v583_v16 = vpop.f32.mrb[10].mxu0  ;;  %728 = vst [vmem:[%s1722_s3 + $0x38] sm:$0xff] %v702_v14 }
 0x170   : > { %v584_v18 = vadd.f32 %v583_v16, %v1702_v41  ;;  %v585_v19 = vpop.f32.mrb[11].mxu0  ;;  %727 = vst [vmem:[%s1722_s3 + $0x30] sm:$0xff] %v697_v17  ;;  %s1770_s3 = scalar_lea.hbm %s1893_s6, %s1001_s11 }
 0x171   : > { %v586_v20 = vadd.f32 %v585_v19, %v1704_v42 }
 0x172   : > { %710 = vst [vmem:[%s1709_s8 + $0x28] sm:$0xff] %v584_v18 }
 0x173   : > { %718 = vst [vmem:[%s1713_s22 + $0x28] sm:$0xff] %v586_v20  ;;  %v589_v21 = vpop.f32.mrb[12].mxu0 }
 0x174   : > { %v590_v22 = vadd.f32 %v589_v21, %v1702_v41  ;;  %v591_v23 = vpop.f32.mrb[13].mxu0 }
 0x175   : > { %v592_v24 = vadd.f32 %v591_v23, %v1704_v42 }
 0x176   : > { %711 = vst [vmem:[%s1709_s8 + $0x30] sm:$0xff] %v590_v22 }
 0x177   : > { %719 = vst [vmem:[%s1713_s22 + $0x30] sm:$0xff] %v592_v24  ;;  %v595_v25 = vpop.f32.mrb[14].mxu0 }
 0x178   : > { %v596_v26 = vadd.f32 %v595_v25, %v1702_v41  ;;  %v597_v27 = vpop.f32.mrb[15].mxu0 }
 0x179   : > { %v598_v28 = vadd.f32 %v597_v27, %v1704_v42 }
 0x17a   : > { %712 = vst [vmem:[%s1709_s8 + $0x38] sm:$0xff] %v596_v26 }
 0x17b   : > { %720 = vst [vmem:[%s1713_s22 + $0x38] sm:$0xff] %v598_v28 }
 0x17c   : > { %1297 = shalt.err (!%p1294_p1)
}
 0x17d   : > { %s1298_s0 = scalar_lea.hbm %s1764_s16, 1024  ;;  %s1302_s2 = scalar_lea.hbm %s1892_s5, 2048 }
 0x17e   : > { %p1299_p2 = scmp.ne.s32.totalorder %s1764_s16, %s1298_s0  ;;  %p1303_p13 = scmp.lt.u32.totalorder %s1764_s16, %s1892_s5 }
 0x17f   : > { %p1304_p4 = scmp.lt.u32.totalorder %s1302_s2, %s1298_s0  ;;  %p1306_p8 = scmp.lt.u32.totalorder %s1298_s0, %s1764_s16 }
 0x180   : > { %p1300_p3 = pnand %p1299_p2, %p1578_p10 }
 0x181   : > { %p1305_p6 = por %p1304_p4, %p1303_p13 }
 0x182   : > { %p1301_p7 = pneg %p1300_p3 }
 0x183   : > { %p1307_p12 = por %p1306_p8, %p1305_p6 }
 0x185   : > { %p1308_p11 = pnand %p1307_p12, %p1301_p7 }
 0x187   : > { %1311 = shalt.err (!%p1308_p11)
}
 0x188   : > { %s1440_s14 = smov 128   ;;  %s1441_s20 = smov 8  }
 0x189   : > { %1142 = dma.vmem_to_hbm [thread:$0]  (%p1578_p10), %s1749_s13, 1024, %s1764_s16, %s730_s19, %s1440_s14, %s1440_s14, %s1441_s20  }
 0x18a   : > { %s1921_s12 = sand.u32 1, %s1515_s30   ;;  %s1312_s0 = scalar_lea.vmem %s1752_s9, 1024 }
 0x18b   : > { %s1810_s27 = scalar_lea.sflag [#allocation9], %s1921_s12  ;;  %p1313_p0 = scmp.ne.s32.totalorder %s1752_s9, %s1312_s0 }
 0x18c   : > { %s1442_s8 = smov [#allocation8]  }
 0x18d   : > { %p1314_p5 = pnand %p1313_p0, %p1578_p10  ;;  %s1316_s22 = sshll.u32 %s1442_s8, 4  ;;  %s1317_s22 = int_to_ptr.vmem [resolvable:$false] %s1316_s22 }
 0x18e   : > { %s1318_s2 = scalar_lea.vmem %s1317_s22, 2048  ;;  %p1319_p1 = scmp.lt.s32.totalorder %s1752_s9, %s1317_s22 }
 0x18f   : > { %p1315_p9 = pneg %p1314_p5  ;;  %p1320_p2 = scmp.lt.s32.totalorder %s1318_s2, %s1312_s0 }
 0x191   : > { %p1321_p3 = por %p1320_p2, %p1319_p1 }
 0x193   : > { %p1322_p7 = pnand %p1321_p3, %p1315_p9 }
 0x195   : > { %1325 = shalt.err (!%p1322_p7)
}
 0x196   : > { %s1326_s30 = scalar_lea.hbm %s1770_s3, 1024  ;;  %s1330_s16 = scalar_lea.hbm %s1893_s6, 2048 }
 0x197   : > { %p1327_p13 = scmp.ne.s32.totalorder %s1770_s3, %s1326_s30  ;;  %p1331_p8 = scmp.lt.u32.totalorder %s1770_s3, %s1893_s6 }
 0x198   : > { %p1332_p12 = scmp.lt.u32.totalorder %s1330_s16, %s1326_s30  ;;  %p1334_p0 = scmp.lt.u32.totalorder %s1326_s30, %s1770_s3 }
 0x199   : > { %p1328_p4 = pnand %p1327_p13, %p1578_p10 }
 0x19a   : > { %p1333_p11 = por %p1332_p12, %p1331_p8 }
 0x19b   : > { %p1329_p6 = pneg %p1328_p4 }
 0x19c   : > { %p1335_p5 = por %p1334_p0, %p1333_p11 }
 0x19e   : > { %p1336_p9 = pnand %p1335_p5, %p1329_p6 }
 0x1a0   : > { %1339 = shalt.err (!%p1336_p9)
}
 0x1a1   : > { %1143 = dma.vmem_to_hbm [thread:$0]  (%p1578_p10), %s1752_s9, 1024, %s1770_s3, %s1810_s27, %s1440_s14, %s1440_s14, %s1441_s20  }
 0x1a2   : > { %s1340_s4 = scalar_lea.vmem %s1772_s18, 1024  ;;  %s1443_s12 = smov [#allocation10]  }
 0x1a3   : > { %p1341_p1 = scmp.ne.s32.totalorder %s1772_s18, %s1340_s4  ;;  %s1344_s0 = sshll.u32 %s1443_s12, 4  ;;  %s1345_s0 = int_to_ptr.vmem [resolvable:$false] %s1344_s0 }
 0x1a4   : > { %s1346_s8 = scalar_lea.vmem %s1345_s0, 2048  ;;  %p1347_p7 = scmp.lt.s32.totalorder %s1772_s18, %s1345_s0 }
 0x1a5   : > { %p1342_p2 = pnand %p1341_p1, %p1578_p10  ;;  %p1348_p13 = scmp.lt.s32.totalorder %s1346_s8, %s1340_s4 }
 0x1a7   : > { %p1343_p3 = pneg %p1342_p2  ;;  %p1349_p4 = por %p1348_p13, %p1347_p7 }
 0x1a9   : > { %p1350_p6 = pnand %p1349_p4, %p1343_p3 }
 0x1ab   : > { %1353 = shalt.err (!%p1350_p6)
}
 0x1ac   : > { %s1354_s9 = scalar_lea.hbm %s1778_s1, 1024  ;;  %s1358_s2 = scalar_lea.hbm %s1894_s7, 2048 }
 0x1ad   : > { %p1355_p8 = scmp.ne.s32.totalorder %s1778_s1, %s1354_s9  ;;  %p1359_p0 = scmp.lt.u32.totalorder %s1778_s1, %s1894_s7 }
 0x1ae   : > { %p1360_p5 = scmp.lt.u32.totalorder %s1358_s2, %s1354_s9  ;;  %p1362_p1 = scmp.lt.u32.totalorder %s1354_s9, %s1778_s1 }
 0x1af   : > { %p1356_p12 = pnand %p1355_p8, %p1578_p10 }
 0x1b0   : > { %p1361_p9 = por %p1360_p5, %p1359_p0 }
 0x1b1   : > { %p1357_p11 = pneg %p1356_p12 }
 0x1b2   : > { %p1363_p2 = por %p1362_p1, %p1361_p9 }
 0x1b4   : > { %p1364_p3 = pnand %p1363_p2, %p1357_p11 }
 0x1b6   : > { %1367 = shalt.err (!%p1364_p3)
}
 0x1b7   : > { %1144 = dma.vmem_to_hbm [thread:$0]  (%p1578_p10), %s1772_s18, 1024, %s1778_s1, %s1810_s27, %s1440_s14, %s1440_s14, %s1441_s20  }
 0x1b8 PF: > { %s806_s13 = sand.u32 1, %s1410_s24   ;;  %p1922_p7 = scmp.ne.s32.totalorder %s1905_s10, 0 }
 0x1b9   : > { %p1923_p13 = scmp.ge.s32.totalorder %s1430_s29, 2  ;;  %s807_s16 = scalar_lea.sflag [#allocation4], %s806_s13 }
 0x1bb   : > { %p1157_p4 = pnand %p1923_p13, %p1922_p7 }
 0x1bd   : > { %1401 = dma.done.wait (!%p1157_p4), %s807_s16, 1024  }
 0x1be   : > { %1403 = vsyncadd (!%p1157_p4), %s807_s16, 4294966272  ;;  %s1924_s21 = sadd.s32 4294967294, %s1430_s29  }
 0x1bf   : > { %s815_s19 = sand.u32 1, %s1924_s21  }
 0x1c0   : > { %s816_s11 = scalar_lea.sflag [#allocation9], %s815_s19 }
 0x1c1   : > { %1405 = dma.done.wait (!%p1157_p4), %s816_s11, 2048  }
 0x1c2   : > { %1407 = vsyncadd (!%p1157_p4), %s816_s11, 4294965248  ;;  %s28_s29 = sadd.s32 1, %s1430_s29   ;;  %s1925_s24 = smov %s1414_s25 }
 0x1c3   : > { %p25_p10 = scmp.ge.s32.totalorder %s28_s29, 4   ;;  %s1926_s25 = smov %s1418_s26 }
 0x1c4   : > { %s1927_s26 = smov %s1587_s23  ;;  %s1928_s27 = smov %s1426_s28 }
 0x1c5   : > { %s1929_s28 = smov %s1931_s15  ;;  %27 = sbr.rel (!%p25_p10) target bundleno = 15 (0xf), region = 127 }
 0x1cc   :  { %830 = vsyncpa [#allocation3], 1 }
 0x1cd   :  { %832 = vsyncpa [#allocation3 + $0x1], 1 }
 0x1ce   :  { %833 = vsyncpa [#allocation6], 1 }
 0x1cf   :  { %834 = vsyncpa [#allocation4], 1 }
 0x1d0   :  { %836 = vsyncpa [#allocation4 + $0x1], 1 }
 0x1d1   :  { %837 = vsyncpa [#allocation9], 1 }
 0x1d2   :  { %839 = vsyncpa [#allocation9 + $0x1], 1 }

</bundles_post_ra>
